<compile_context>
chip_gen: v5e
topology: v5e:2x2
jax: 0.10.0
libtpu: 0.0.40
codegen_flags: <defaults>
</compile_context>

<pallas_src>
import jax
import jax.numpy as jnp
from jax.experimental import pallas as pl
from jax.experimental.pallas import tpu as pltpu


def _round_up(a, m):
    return (a + m - 1) // m * m


def gpn_head_kernel(x_ref, w_ref, b_ref, packed_ref):
    x = x_ref[...]                      # (tile_n, D)  compute dtype (bf16/f32)
    w = w_ref[...]                      # (D, C)       compute dtype
    b = b_ref[...]                      # (1, C)       f32

    # forward_impl: linear backbone -> logits (f32 accumulation on the MXU)
    logits = jnp.dot(x, w, preferred_element_type=jnp.float32) + b   # (tile_n, C)

    # F.log_softmax(x, dim=-1) / softmax, sharing a single exp over the tile.
    m = jnp.max(logits, axis=-1, keepdims=True)
    shifted = logits - m
    e = jnp.exp(shifted)
    s = jnp.sum(e, axis=-1, keepdims=True)
    log_soft = shifted - jnp.log(s)
    soft = e / s                        # exact divide (keeps tight tolerances)

    # Single lane-packed output slab: [logits | log_soft | soft]  -> (tile_n, 3C)
    packed_ref[...] = jnp.concatenate([logits, log_soft, soft],
                                      axis=-1).astype(packed_ref.dtype)


def gpn_model_forward(x, w, b, *, tile_n=1024, compute_dtype=jnp.bfloat16):
    """Returns a dict mimicking the Prediction named-tuple fields."""
    N, D = x.shape
    Dw, C = w.shape
    assert Dw == D

    # Cast inputs for MXU-native bf16 matmul (halves x/W DMA traffic).
    x_c = x.astype(compute_dtype)
    w_c = w.astype(compute_dtype)
    b2 = b.reshape(1, C).astype(jnp.float32)

    # Choose the tile: large (amortize per-step overhead), multiple of 128,
    # but no larger than the (padded) problem.
    tile = min(_round_up(tile_n, 128), _round_up(N, 128))
    n_pad = _round_up(N, tile)
    if n_pad != N:
        # Zero-padded rows produce benign values and are sliced off below.
        x_c = jnp.pad(x_c, ((0, n_pad - N), (0, 0)))

    grid = (n_pad // tile,)

    # Explicit VMEM budget: 2 pipeline buffers x (x tile + packed-out tile)
    # + resident W/b + headroom.  Clamped well under v7x's 64 MiB physical.
    in_bytes = tile * D * jnp.dtype(compute_dtype).itemsize
    out_bytes = tile * 3 * C * 4
    resident = D * C * jnp.dtype(compute_dtype).itemsize + C * 4
    vmem_budget = 2 * (in_bytes + out_bytes) + resident + (2 << 20)
    vmem_budget = int(min(max(vmem_budget, 4 << 20), 48 << 20))

    packed = pl.pallas_call(
        gpn_head_kernel,
        out_shape=jax.ShapeDtypeStruct((n_pad, 3 * C), jnp.float32),
        grid_spec=pltpu.PrefetchScalarGridSpec(
            num_scalar_prefetch=0,
            grid=grid,
            in_specs=[
                pl.BlockSpec((tile, D), lambda i: (i, 0)),   # x tile
                pl.BlockSpec((D, C), lambda i: (0, 0)),      # W (resident)
                pl.BlockSpec((1, C), lambda i: (0, 0)),      # b (resident)
            ],
            out_specs=pl.BlockSpec((tile, 3 * C), lambda i: (i, 0)),
        ),
        compiler_params=pltpu.CompilerParams(
            dimension_semantics=("parallel",),
            vmem_limit_bytes=vmem_budget,
        ),
    )(x_c, w_c, b2)

    packed = packed[:N]
    logits = packed[:, 0:C]
    log_soft = packed[:, C:2 * C]
    soft = packed[:, 2 * C:3 * C]

    # max_soft, hard = soft.max(dim=-1): trivially cheap on the [N, C] result.
    max_soft = jnp.max(soft, axis=-1)
    hard = jnp.argmax(soft, axis=-1).astype(jnp.int32)

    return {
        "soft": soft,
        "log_soft": log_soft,
        "hard": hard,
        "logits": logits,
        "prediction_confidence_aleatoric": max_soft,
        "prediction_confidence_epistemic": None,
        "prediction_confidence_structure": None,
        "sample_confidence_aleatoric": max_soft,
        "sample_confidence_epistemic": None,
        "sample_confidence_features": None,
        "sample_confidence_structure": None,
    }


if __name__ == "__main__":
    key = jax.random.PRNGKey(0)
    k_x, k_w, k_b = jax.random.split(key, 3)

    N, D, C = 128, 32, 8            # nodes, feature dim, classes
    x = jax.random.normal(k_x, (N, D), dtype=jnp.float32)
    w = jax.random.normal(k_w, (D, C), dtype=jnp.float32) * 0.1
    b = jax.random.normal(k_b, (C,), dtype=jnp.float32) * 0.01

    pred = gpn_model_forward(x, w, b)
    jax.block_until_ready(pred["soft"])
    jax.block_until_ready(pred["hard"])

    # Reference mirrors the kernel's compute dtype (bf16 inputs, f32 accum).
    xb = x.astype(jnp.bfloat16).astype(jnp.float32)
    wb = w.astype(jnp.bfloat16).astype(jnp.float32)
    logits_ref = xb @ wb + b
    log_soft_ref = jax.nn.log_softmax(logits_ref, axis=-1)
    soft_ref = jnp.exp(log_soft_ref)

    assert jnp.allclose(pred["logits"], logits_ref, atol=1e-4)
    assert jnp.allclose(pred["log_soft"], log_soft_ref, atol=1e-4)
    assert jnp.allclose(pred["soft"], soft_ref, atol=1e-5)
    assert jnp.allclose(pred["prediction_confidence_aleatoric"],
                        jnp.max(soft_ref, axis=-1), atol=1e-5)
    assert jnp.array_equal(pred["hard"],
                           jnp.argmax(soft_ref, axis=-1).astype(jnp.int32))

    print("KERNEL_OK")
</pallas_src>

<mosaic_0001>
module attributes {stable_mosaic.version = 11 : i64} {
  func.func @gpn_head_kernel(%arg0: i32, %arg1: memref<128x32xbf16, #tpu.memory_space<vmem>>, %arg2: memref<32x8xbf16, #tpu.memory_space<vmem>>, %arg3: memref<1x8xf32, #tpu.memory_space<vmem>>, %arg4: memref<128x24xf32, #tpu.memory_space<vmem>>) attributes {dimension_semantics = [#tpu.dimension_semantics<parallel>], iteration_bounds = array<i64: 1>, scalar_prefetch = 0 : i64, scratch_operands = 0 : i64, tpu.core_type = #tpu.core_type<tc>, window_params = [{transform_indices = @transform_0, window_bounds = array<i64: 128, 32>}, {pipeline_mode = #tpu.pipeline_mode<synchronous>, transform_indices = @transform_1, window_bounds = array<i64: 32, 8>}, {pipeline_mode = #tpu.pipeline_mode<synchronous>, transform_indices = @transform_2, window_bounds = array<i64: 1, 8>}, {transform_indices = @transform_3, window_bounds = array<i64: 128, 24>}]} {
    %c0 = arith.constant 0 : index
    %c0_0 = arith.constant 0 : index
    %0 = vector.load %arg1[%c0, %c0_0] : memref<128x32xbf16, #tpu.memory_space<vmem>>, vector<128x32xbf16>
    %c0_1 = arith.constant 0 : index
    %c0_2 = arith.constant 0 : index
    %1 = vector.load %arg2[%c0_1, %c0_2] : memref<32x8xbf16, #tpu.memory_space<vmem>>, vector<32x8xbf16>
    %c0_3 = arith.constant 0 : index
    %c0_4 = arith.constant 0 : index
    %2 = vector.load %arg3[%c0_3, %c0_4] : memref<1x8xf32, #tpu.memory_space<vmem>>, vector<1x8xf32>
    %cst = arith.constant dense<0.000000e+00> : vector<128x8xf32>
    %3 = tpu.matmul %0, %1, %cst {dimension_numbers = #tpu.dot_dimension_numbers<[1], [0], [0], [1], [0, 0, 1, 1], [], []>} : vector<128x32xbf16>, vector<32x8xbf16>, vector<128x8xf32> -> vector<128x8xf32>
    %4 = vector.broadcast %2 : vector<1x8xf32> to vector<128x8xf32>
    %5 = arith.addf %3, %4 : vector<128x8xf32>
    %cst_5 = arith.constant dense<0xFF800000> : vector<128xf32>
    %6 = vector.multi_reduction <maximumf>, %5, %cst_5 [1] : vector<128x8xf32> to vector<128xf32>
    %7 = vector.shape_cast %6 : vector<128xf32> to vector<128x1xf32>
    %8 = vector.broadcast %7 : vector<128x1xf32> to vector<128x8xf32>
    %9 = arith.subf %5, %8 : vector<128x8xf32>
    %10 = math.exp %9 : vector<128x8xf32>
    %cst_6 = arith.constant dense<0.000000e+00> : vector<128xf32>
    %11 = vector.multi_reduction <add>, %10, %cst_6 [1] : vector<128x8xf32> to vector<128xf32>
    %12 = vector.shape_cast %11 : vector<128xf32> to vector<128x1xf32>
    %13 = math.log %12 : vector<128x1xf32>
    %14 = vector.broadcast %13 : vector<128x1xf32> to vector<128x8xf32>
    %15 = arith.subf %9, %14 : vector<128x8xf32>
    %16 = vector.broadcast %12 : vector<128x1xf32> to vector<128x8xf32>
    %17 = arith.divf %10, %16 : vector<128x8xf32>
    %18 = tpu.concatenate %5, %15, %17 in 1 : vector<128x8xf32>, vector<128x8xf32>, vector<128x8xf32> -> vector<128x24xf32>
    %c0_7 = arith.constant 0 : index
    %c0_8 = arith.constant 0 : index
    %19 = vector.load %arg4[%c0_7, %c0_8] : memref<128x24xf32, #tpu.memory_space<vmem>>, vector<128x24xf32>
    tpu.vector_store %arg4[%c0_7, %c0_8], %18 {strides = array<i32>} : memref<128x24xf32, #tpu.memory_space<vmem>>, vector<128x24xf32>,
    return
  }
  func.func @transform_0(%arg0: i32) -> (i32, i32) {
    %c0_i32 = arith.constant 0 : i32
    %c0_i32_0 = arith.constant 0 : i32
    return %arg0, %c0_i32 : i32, i32
  }
  func.func @transform_1(%arg0: i32) -> (i32, i32) {
    %c0_i32 = arith.constant 0 : i32
    %c0_i32_0 = arith.constant 0 : i32
    %c0_i32_1 = arith.constant 0 : i32
    return %c0_i32, %c0_i32_0 : i32, i32
  }
  func.func @transform_2(%arg0: i32) -> (i32, i32) {
    %c0_i32 = arith.constant 0 : i32
    %c0_i32_0 = arith.constant 0 : i32
    %c0_i32_1 = arith.constant 0 : i32
    return %c0_i32, %c0_i32_0 : i32, i32
  }
  func.func @transform_3(%arg0: i32) -> (i32, i32) {
    %c0_i32 = arith.constant 0 : i32
    %c0_i32_0 = arith.constant 0 : i32
    return %arg0, %c0_i32 : i32, i32
  }
}

</mosaic_0001>

<bundles_post_ra>
// kernel: tpu_custom_call.1
= control target key start
LH: loop header
LB: loop body
LE: loop exit
PB: predicated region body
PF: predicated region fallthrough
CT: control target
= control target key end

     0   :  { %vm91_vm0 = vcmask 261120   ;;  %vm165_vm1 = vcmask 64512   ;;  %s1738_s1 = inlined_call_operand.vmem [shape: bf16[32,8], index: 1, kind: input, shape index: {}]   ;;  %s1739_s0 = inlined_call_operand.vmem [shape: bf16[128,32], index: 0, kind: input, shape index: {}]   ;;  %s1740_s2 = inlined_call_operand.vmem [shape: f32[1,8], index: 2, kind: input, shape index: {}]   ;;  %s1741_s3 = inlined_call_operand.vmem [shape: f32[128,24], index: 3, kind: output, shape index: {}]  }
   0x1   :  { %v837_v0 = vld [vmem:[%s1738_s1 + $0x8] sm:$0xff]  ;;  %v836_v1 = vld [vmem:[%s1738_s1] sm:$0xff]  ;;  %v830_v3 = vld [vmem:[%s1739_s0 + $0x10] sm:$0xff] }
   0x2   :  { %122 = vmatpush.bf16.msra.mxu0 %v837_v0  ;;  %838 = vmatpush.bf16.msra.mxu1 %v837_v0  ;;  %v828_v2 = vld [vmem:[%s1739_s0] sm:$0xff]  ;;  %v834_v4 = vld [vmem:[%s1739_s0 + $0x30] sm:$0xff]  ;;  %v829_v6 = vld [vmem:[%s1739_s0 + $0x8] sm:$0xff] }
   0x3   :  { %840 = vmatpush.bf16.msra.mxu3 %v837_v0  ;;  %839 = vmatpush.bf16.msra.mxu2 %v837_v0  ;;  %v832_v5 = vld [vmem:[%s1739_s0 + $0x20] sm:$0xff]  ;;  %v831_v7 = vld [vmem:[%s1739_s0 + $0x18] sm:$0xff]  ;;  %v833_v8 = vld [vmem:[%s1739_s0 + $0x28] sm:$0xff] }
   0x4   :  { %v835_v9 = vld [vmem:[%s1739_s0 + $0x38] sm:$0xff]  ;;  %v1006_v10 = vld [vmem:[%s1740_s2] ss:$0 sm:$0xff]  ;;  %s943_s0 = smov 8   ;;  %s944_s2 = smov 16  }
   0x6   :  { %123 = vmatpush.bf16.msra.mxu0 %v836_v1  ;;  %841 = vmatpush.bf16.msra.mxu1 %v836_v1 }
   0x7   :  { %843 = vmatpush.bf16.msra.mxu3 %v836_v1  ;;  %842 = vmatpush.bf16.msra.mxu2 %v836_v1 }
   0x9   :  { %820 = vmatmul.msk.bf16.vlgmr.msra.gmra.mxu0 %vm91_vm0, %v828_v2  ;;  %822 = vmatmul.msk.bf16.vlgmr.msra.gmra.mxu1 %vm91_vm0, %v830_v3 }
   0xa   :  { %826 = vmatmul.msk.bf16.vlgmr.msra.gmra.mxu3 %vm91_vm0, %v834_v4  ;;  %824 = vmatmul.msk.bf16.vlgmr.msra.gmra.mxu2 %vm91_vm0, %v832_v5 }
  0x19   :  { %821 = vmatmul.msk.bf16.gmra.mxu0 %vm91_vm0, %v829_v6  ;;  %823 = vmatmul.msk.bf16.gmra.mxu1 %vm91_vm0, %v831_v7 }
  0x1a   :  { %825 = vmatmul.msk.bf16.gmra.mxu2 %vm91_vm0, %v833_v8  ;;  %827 = vmatmul.msk.bf16.gmra.mxu3 %vm91_vm0, %v835_v9 }
  0x86   :  { %v125_v11 = vpop.f32.mrf.mxu0  ;;  %v135_v12 = vpop.f32.mrf.mxu1 }
  0x87   :  { %v1009_v13 = vadd.f32 %v1006_v10, %v125_v11  ;;  %v1012_v14 = vadd.f32 %v1006_v10, %v135_v12 }
  0x89   :  { %v178_v15 = vsel %vm165_vm1, %v1012_v14, -inf  ;;  %v166_v16 = vsel %vm165_vm1, %v1009_v13, -inf }
  0x8a   :  { %179 = vmax.xlane.f32.xlu2 %v178_v15  ;;  %167 = vmax.xlane.f32.xlu0 %v166_v16 }
  0x8d   :  { %v155_v17 = vpop.f32.mrf.mxu3  ;;  %v145_v18 = vpop.f32.mrf.mxu2 }
  0x8e   :  { %v1019_v19 = vadd.f32 %v1006_v10, %v155_v17  ;;  %v1022_v20 = vadd.f32 %v1006_v10, %v145_v18  ;;  %v127_v21 = vpop.f32.mrf.mxu0  ;;  %v137_v24 = vpop.f32.mrf.mxu1 }
  0x8f   :  { %v1029_v25 = vadd.f32 %v1006_v10, %v127_v21  ;;  %v1032_v26 = vadd.f32 %v1006_v10, %v137_v24 }
  0x90   :  { %v190_v22 = vsel %vm165_vm1, %v1022_v20, -inf  ;;  %v202_v23 = vsel %vm165_vm1, %v1019_v19, -inf }
  0x91   :  { %1752 = vst [vmem:[#allocation2_spill] sm:$0xff] %v1032_v26  ;;  %v181_v32 = vsel %vm165_vm1, %v1032_v26, -inf  ;;  %v169_v33 = vsel %vm165_vm1, %v1029_v25, -inf }
  0x92   :  { %191 = vmax.xlane.f32.xlu2 %v190_v22  ;;  %203 = vmax.xlane.f32.xlu0 %v202_v23 }
  0x95   :  { %v157_v27 = vpop.f32.mrf.mxu3  ;;  %v147_v28 = vpop.f32.mrf.mxu2 }
  0x96   :  { %v1035_v29 = vadd.f32 %v1006_v10, %v157_v27  ;;  %v130_v30 = vpop.f32.mrf.mxu0  ;;  %v1047_v35 = vadd.f32 %v1006_v10, %v147_v28  ;;  %v140_v41 = vpop.f32.mrf.mxu1 }
  0x97   :  { %v1044_v34 = vadd.f32 %v1006_v10, %v130_v30  ;;  %v1062_v44 = vadd.f32 %v1006_v10, %v140_v41 }
  0x98   :  { %1753 = vst [vmem:[#allocation3_spill] sm:$0xff] %v1035_v29  ;;  %v205_v31 = vsel %vm165_vm1, %v1035_v29, -inf  ;;  %v193_v42 = vsel %vm165_vm1, %v1047_v35, -inf }
  0x99   :  { %206 = vmax.xlane.f32.xlu1 %v205_v31  ;;  %1754 = vst [vmem:[#allocation4_spill] sm:$0xff] %v1044_v34  ;;  %v172_v39 = vsel %vm165_vm1, %v1044_v34, -inf  ;;  %v184_v48 = vsel %vm165_vm1, %v1062_v44, -inf }
  0x9a   :  { %182 = vmax.xlane.f32.xlu2 %v181_v32  ;;  %170 = vmax.xlane.f32.xlu0 %v169_v33  ;;  %1755 = vst [vmem:[#allocation5_spill] sm:$0xff] %v1047_v35 }
  0x9b   :  { %1757 = vst [vmem:[#allocation7_spill] sm:$0xff] %v1062_v44 }
  0x9d   :  { %v150_v36 = vpop.f32.mrf.mxu2  ;;  %v160_v37 = vpop.f32.mrf.mxu3 }
  0x9e   :  { %v1050_v38 = vadd.f32 %v1006_v10, %v160_v37  ;;  %v1059_v43 = vadd.f32 %v1006_v10, %v150_v36  ;;  %v132_v49 = vpop.f32.mrf.mxu0  ;;  %v142_v56 = vpop.f32.mrf.mxu1 }
  0x9f   :  { %v1074_v52 = vadd.f32 %v1006_v10, %v132_v49  ;;  %v1084_v57 = vadd.f32 %v1006_v10, %v142_v56 }
  0xa0   :  { %1756 = vst [vmem:[#allocation6_spill] sm:$0xff] %v1050_v38  ;;  %v208_v40 = vsel %vm165_vm1, %v1050_v38, -inf  ;;  %v196_v47 = vsel %vm165_vm1, %v1059_v43, -inf }
  0xa1   :  { %173 = vmax.xlane.f32.xlu1 %v172_v39  ;;  %1759 = vst [vmem:[#allocation9_spill] sm:$0xff] %v1074_v52  ;;  %v175_v54 = vsel %vm165_vm1, %v1074_v52, -inf  ;;  %v187_v58 = vsel %vm165_vm1, %v1084_v57, -inf }
  0xa2   :  { %209 = vmax.xlane.f32.xlu2 %v208_v40  ;;  %194 = vmax.xlane.f32.xlu0 %v193_v42  ;;  %1761 = vst [vmem:[#allocation11_spill] sm:$0xff] %v1084_v57 }
  0xa5   :  { %v152_v45 = vpop.f32.mrf.mxu2  ;;  %v162_v51 = vpop.f32.mrf.mxu3 }
  0xa6   :  { %v1065_v46 = vadd.f32 %v1006_v10, %v152_v45  ;;  %v1077_v53 = vadd.f32 %v1006_v10, %v162_v51 }
  0xa8   :  { %1758 = vst [vmem:[#allocation8_spill] sm:$0xff] %v1065_v46  ;;  %v199_v50 = vsel %vm165_vm1, %v1065_v46, -inf  ;;  %v211_v55 = vsel %vm165_vm1, %v1077_v53, -inf }
  0xa9   :  { %197 = vmax.xlane.f32.xlu1 %v196_v47  ;;  %1760 = vst [vmem:[#allocation10_spill] sm:$0xff] %v1077_v53 }
  0xaa   :  { %200 = vmax.xlane.f32.xlu2 %v199_v50  ;;  %185 = vmax.xlane.f32.xlu0 %v184_v48 }
  0xb1   :  { %176 = vmax.xlane.f32.xlu1 %v175_v54 }
  0xb2   :  { %212 = vmax.xlane.f32.xlu0 %v211_v55 }
  0xb9   :  { %188 = vmax.xlane.f32.xlu1 %v187_v58 }
  0xfd   :  { %v180_v59 = vpop.xlane.xlu2 %179  ;;  %v168_v60 = vpop.xlane.xlu0 %167 }
  0xfe   :  { %v1089_v61 = vsub.f32 %v1012_v14, %v180_v59  ;;  %v1092_v62 = vsub.f32 %v1009_v13, %v168_v60 }
 0x100   :  { %v238_v63 = vmul.f32 1.442695, %v1089_v61  ;;  %v230_v0 = vmul.f32 1.442695, %v1092_v62 }
 0x102   :  { %847 = vpow2.f32 %v238_v63 }
 0x103   :  { %849 = vpow2.f32 %v230_v0 }
 0x105   :  { %v192_v1 = vpop.xlane.xlu2 %191  ;;  %v204_v2 = vpop.xlane.xlu0 %203 }
 0x106   :  { %v1097_v3 = vsub.f32 %v1022_v20, %v192_v1  ;;  %v1100_v4 = vsub.f32 %v1019_v19, %v204_v2 }
 0x108   :  { %v1102_v5 = vpop.eup %847  ;;  %v246_v6 = vmul.f32 1.442695, %v1097_v3  ;;  %v254_v7 = vmul.f32 1.442695, %v1100_v4 }
 0x109   :  { %v1106_v8 = vpop.eup %849  ;;  %v274_v9 = vsel %vm165_vm1, %v1102_v5, 0.0 }
 0x10a   :  { %851 = vpow2.f32 %v246_v6  ;;  %275 = vadd.xlane.f32.xlu2 %v274_v9  ;;  %v262_v10 = vsel %vm165_vm1, %v1106_v8, 0.0 }
 0x10b   :  { %853 = vpow2.f32 %v254_v7  ;;  %263 = vadd.xlane.f32.xlu1 %v262_v10 }
 0x10c   :  { %v207_v11 = vpop.xlane.xlu1 %206 }
 0x10d   :  { %v183_v12 = vpop.xlane.xlu2 %182  ;;  %v171_v15 = vpop.xlane.xlu0 %170  ;;  %v1121_v21 = vsub.f32 %v1035_v29, %v207_v11 }
 0x10e   :  { %v1113_v16 = vsub.f32 %v1032_v26, %v183_v12  ;;  %v1116_v17 = vsub.f32 %v1029_v25, %v171_v15 }
 0x10f   :  { %v256_v30 = vmul.f32 1.442695, %v1121_v21 }
 0x110   :  { %v1118_v18 = vpop.eup %851  ;;  %v240_v22 = vmul.f32 1.442695, %v1113_v16  ;;  %v232_v23 = vmul.f32 1.442695, %v1116_v17 }
 0x111   :  { %v1125_v24 = vpop.eup %853  ;;  %v286_v27 = vsel %vm165_vm1, %v1118_v18, 0.0 }
 0x112   :  { %855 = vpow2.f32 %v240_v22  ;;  %287 = vadd.xlane.f32.xlu0 %v286_v27  ;;  %v298_v28 = vsel %vm165_vm1, %v1125_v24, 0.0 }
 0x113   :  { %857 = vpow2.f32 %v232_v23  ;;  %299 = vadd.xlane.f32.xlu1 %v298_v28 }
 0x114   :  { %v174_v31 = vpop.xlane.xlu1 %173  ;;  %859 = vpow2.f32 %v256_v30 }
 0x115   :  { %v1133_v32 = vsub.f32 %v1044_v34, %v174_v31  ;;  %v210_v33 = vpop.xlane.xlu2 %209  ;;  %v195_v36 = vpop.xlane.xlu0 %194 }
 0x116   :  { %v1136_v37 = vsub.f32 %v1047_v35, %v195_v36  ;;  %v1142_v41 = vsub.f32 %v1050_v38, %v210_v33 }
 0x117   :  { %v234_v39 = vmul.f32 1.442695, %v1133_v32 }
 0x118   :  { %v1139_v40 = vpop.eup %855  ;;  %v248_v42 = vmul.f32 1.442695, %v1136_v37  ;;  %v258_v49 = vmul.f32 1.442695, %v1142_v41 }
 0x119   :  { %v1145_v45 = vpop.eup %857  ;;  %861 = vpow2.f32 %v234_v39  ;;  %v277_v47 = vsel %vm165_vm1, %v1139_v40, 0.0 }
 0x11a   :  { %278 = vadd.xlane.f32.xlu0 %v277_v47  ;;  %v265_v48 = vsel %vm165_vm1, %v1145_v45, 0.0  ;;  %863 = vpow2.f32 %v248_v42  ;;  %v1155_v56 = vpop.eup %859 }
 0x11b   :  { %266 = vadd.xlane.f32.xlu2 %v265_v48  ;;  %865 = vpow2.f32 %v258_v49  ;;  %v301_v6 = vsel %vm165_vm1, %v1155_v56, 0.0 }
 0x11c   :  { %v198_v50 = vpop.xlane.xlu1 %197 }
 0x11d   :  { %v1153_v51 = vsub.f32 %v1059_v43, %v198_v50  ;;  %v201_v54 = vpop.xlane.xlu2 %200  ;;  %v186_v55 = vpop.xlane.xlu0 %185 }
 0x11e   :  { %v1158_v58 = vsub.f32 %v1062_v44, %v186_v55  ;;  %v1164_v63 = vsub.f32 %v1065_v46, %v201_v54 }
 0x11f   :  { %v1160_v59 = vpop.eup %861  ;;  %v250_v60 = vmul.f32 1.442695, %v1153_v51 }
 0x120   :  { %v242_v0 = vmul.f32 1.442695, %v1158_v58  ;;  %v1167_v1 = vpop.eup %863  ;;  %v268_v2 = vsel %vm165_vm1, %v1160_v59, 0.0  ;;  %v252_v9 = vmul.f32 1.442695, %v1164_v63 }
 0x121   :  { %867 = vpow2.f32 %v250_v60  ;;  %v289_v7 = vsel %vm165_vm1, %v1167_v1, 0.0  ;;  %v1179_v15 = vpop.eup %865 }
 0x122   :  { %269 = vadd.xlane.f32.xlu0 %v268_v2  ;;  %869 = vpow2.f32 %v242_v0  ;;  %290 = vadd.xlane.f32.xlu1 %v289_v7  ;;  %v304_v30 = vsel %vm165_vm1, %v1179_v15, 0.0 }
 0x123   :  { %302 = vadd.xlane.f32.xlu2 %v301_v6  ;;  %871 = vpow2.f32 %v252_v9 }
 0x124   :  { %v177_v10 = vpop.xlane.xlu1 %176 }
 0x125   :  { %v1177_v11 = vsub.f32 %v1074_v52, %v177_v10  ;;  %v213_v12 = vpop.xlane.xlu0 %212 }
 0x126   :  { %v1185_v27 = vsub.f32 %v1077_v53, %v213_v12 }
 0x127   :  { %v1181_v22 = vpop.eup %867  ;;  %v236_v23 = vmul.f32 1.442695, %v1177_v11 }
 0x128   :  { %v1187_v28 = vpop.eup %869  ;;  %v292_v31 = vsel %vm165_vm1, %v1181_v22, 0.0  ;;  %v260_v36 = vmul.f32 1.442695, %v1185_v27 }
 0x129   :  { %873 = vpow2.f32 %v236_v23  ;;  %v280_v33 = vsel %vm165_vm1, %v1187_v28, 0.0  ;;  %v1199_v47 = vpop.eup %871 }
 0x12a   :  { %305 = vadd.xlane.f32.xlu0 %v304_v30  ;;  %281 = vadd.xlane.f32.xlu1 %v280_v33  ;;  %875 = vpow2.f32 %v260_v36  ;;  %v295_v50 = vsel %vm165_vm1, %v1199_v47, 0.0 }
 0x12b   :  { %293 = vadd.xlane.f32.xlu2 %v292_v31 }
 0x12c   :  { %v189_v39 = vpop.xlane.xlu1 %188 }
 0x12d   :  { %v1197_v42 = vsub.f32 %v1084_v57, %v189_v39 }
 0x12f   :  { %v1201_v48 = vpop.eup %873  ;;  %v244_v49 = vmul.f32 1.442695, %v1197_v42 }
 0x130   :  { %v271_v54 = vsel %vm165_vm1, %v1201_v48, 0.0  ;;  %v1208_v55 = vpop.eup %875 }
 0x131   :  { %877 = vpow2.f32 %v244_v49  ;;  %v307_v2 = vsel %vm165_vm1, %v1208_v55, 0.0 }
 0x132   :  { %296 = vadd.xlane.f32.xlu0 %v295_v50  ;;  %272 = vadd.xlane.f32.xlu1 %v271_v54 }
 0x137   :  { %v1210_v60 = vpop.eup %877 }
 0x138   :  { %v283_v0 = vsel %vm165_vm1, %v1210_v60, 0.0 }
 0x139   :  { %284 = vadd.xlane.f32.xlu2 %v283_v0 }
 0x13a   :  { %308 = vadd.xlane.f32.xlu1 %v307_v2 }
 0x17d   :  { %v1216_v6 = vpop.xlane.xlu2 %275 }
 0x17e   :  { %v1218_v7 = vpop.xlane.xlu1 %263  ;;  %879 = vrcp.f32 %v1216_v6  ;;  %vm423_vm2 = vweird.f32 %v1216_v6 }
 0x17f   :  { %881 = vlog2.f32 %v1216_v6  ;;  %v369_v29 = vand.u32 2147483648, %v1218_v7  ;;  %vm363_vm5 = vweird.f32 %v1218_v7 }
 0x180   :  { %883 = vlog2.f32 %v1218_v7 }
 0x181   :  { %885 = vrcp.f32 %v1218_v7 }
 0x184   :  { %v1224_v9 = vpop.eup %879 }
 0x185   :  { %v1226_v10 = vpop.xlane.xlu0 %287  ;;  %v882_v12 = vpop.eup %881  ;;  %v419_v50 = vmul.f32 %v1224_v9, %v1216_v6  ;;  %vm424_vm3 = vweird.f32 %v1224_v9 }
 0x186   :  { %v1228_v23 = vpop.xlane.xlu1 %299  ;;  %v884_v30 = vpop.eup %883  ;;  %v319_v31 = vmul.f32 0.6931472, %v882_v12  ;;  %vm1289_vm6 = vmor %vm423_vm2, %vm424_vm3  ;;  %vm483_vm10 = vweird.f32 %v1226_v10 }
 0x187   :  { %v1230_v33 = vpop.eup %885  ;;  %v311_v36 = vmul.f32 0.6931472, %v884_v30  ;;  %887 = vlog2.f32 %v1228_v23 }
 0x188   :  { %v346_v39 = vsub.f32 %v1089_v61, %v319_v31  ;;  %889 = vlog2.f32 %v1226_v10  ;;  %v359_v54 = vmul.f32 %v1230_v33, %v1218_v7  ;;  %vm364_vm4 = vweird.f32 %v1230_v33 }
 0x189   :  { %v342_v49 = vsub.f32 %v1092_v62, %v311_v36  ;;  %891 = vrcp.f32 %v1226_v10  ;;  %v420_v62 = vsub.f32 1.0, %v419_v50  ;;  %vm365_vm7 = vmor %vm363_vm5, %vm364_vm4  ;;  %vm543_vm4 = vweird.f32 %v1228_v23 }
 0x18a   :  { %622 = vrot.lane.b32.xlu0 %v346_v39, %s943_s0  ;;  %v360_v30 = vsub.f32 1.0, %v359_v54 }
 0x18b   :  { %614 = vrot.lane.b32.xlu2 %v342_v49, %s943_s0  ;;  %v421_v54 = vmul.f32 %v1224_v9, %v420_v62  ;;  %v429_v62 = vand.u32 2147483648, %v1216_v6 }
 0x18c   :  { %v361_v50 = vmul.f32 %v1230_v33, %v360_v30  ;;  %v427_v30 = vand.u32 2147483647, %v1216_v6 }
 0x18d   :  { %v888_v0 = vpop.eup %887  ;;  %v1245_v61 = vpop.xlane.xlu0 %278  ;;  %v422_v53 = vadd.f32 %v1224_v9, %v421_v54 }
 0x18e   :  { %v1243_v2 = vpop.xlane.xlu2 %266  ;;  %v890_v12 = vpop.eup %889  ;;  %v335_v31 = vmul.f32 0.6931472, %v888_v0  ;;  %vm428_vm9 = vcmp.eq.f32.partialorder %v427_v30, 8.507059e+37 }
 0x18f   :  { %893 = vrcp.f32 %v1243_v2  ;;  %v327_v36 = vmul.f32 0.6931472, %v890_v12  ;;  %v1249_v38 = vpop.eup %891  ;;  %v426_v6 = vsel %vm1289_vm6, %v1224_v9, %v422_v53  ;;  %v487_v53 = vand.u32 2147483647, %v1226_v10 }
 0x190   :  { %895 = vlog2.f32 %v1243_v2  ;;  %v354_v39 = vsub.f32 %v1100_v4, %v335_v31  ;;  %v479_v0 = vmul.f32 %v1249_v38, %v1226_v10  ;;  %vm484_vm11 = vweird.f32 %v1249_v38 }
 0x191   :  { %897 = vlog2.f32 %v1245_v61  ;;  %v350_v49 = vsub.f32 %v1097_v3, %v327_v36  ;;  %vm1328_vm13 = vmor %vm483_vm10, %vm484_vm11  ;;  %vm378_vm14 = vweird.f32 %v1243_v2  ;;  %vm488_vm0 = vcmp.eq.f32.partialorder %v487_v53, 8.507059e+37 }
 0x192   :  { %899 = vrcp.f32 %v1228_v23  ;;  %638 = vrot.lane.b32.xlu1 %v354_v39, %s943_s0  ;;  %v480_v52 = vsub.f32 1.0, %v479_v0  ;;  %v547_v53 = vand.u32 2147483647, %v1228_v23 }
 0x193   :  { %630 = vrot.lane.b32.xlu2 %v350_v49, %s943_s0  ;;  %v362_v49 = vadd.f32 %v1230_v33, %v361_v50  ;;  %v367_v50 = vand.u32 2147483647, %v1218_v7 }
 0x194   :  { %vm548_vm6 = vcmp.eq.f32.partialorder %v547_v53, 8.507059e+37 }
 0x195   :  { %v1261_v12 = vpop.eup %893  ;;  %v1266_v3 = vpop.xlane.xlu1 %290  ;;  %v366_v7 = vsel %vm365_vm7, %v1230_v33, %v362_v49  ;;  %vm368_vm8 = vcmp.eq.f32.partialorder %v367_v50, 8.507059e+37  ;;  %v384_v50 = vand.u32 2147483648, %v1243_v2  ;;  %vm438_vm7 = vweird.f32 %v1245_v61 }
 0x196   :  { %v896_v4 = vpop.eup %895  ;;  %v374_v31 = vmul.f32 %v1261_v12, %v1243_v2  ;;  %v1276_v57 = vpop.xlane.xlu0 %269  ;;  %901 = vlog2.f32 %v1266_v3  ;;  %vm379_vm12 = vweird.f32 %v1261_v12  ;;  %vm498_vm10 = vweird.f32 %v1266_v3 }
 0x197   :  { %v898_v36 = vpop.eup %897  ;;  %v313_v39 = vmul.f32 0.6931472, %v896_v4  ;;  %v1279_v26 = vpop.xlane.xlu2 %302  ;;  %v430_v4 = vor.u32 1.1754944e-38, %v429_v62  ;;  %vm1335_vm15 = vmor %vm378_vm14, %vm379_vm12 }
 0x198   :  { %v1274_v46 = vpop.eup %899  ;;  %v375_v44 = vsub.f32 1.0, %v374_v31  ;;  %v321_v34 = vmul.f32 0.6931472, %v898_v36  ;;  %v370_v31 = vor.u32 1.1754944e-38, %v369_v29  ;;  %903 = vlog2.f32 %v1279_v26 }
 0x199   :  { %v343_v35 = vsub.f32 %v1116_v17, %v313_v39  ;;  %v539_v17 = vmul.f32 %v1274_v46, %v1228_v23  ;;  %v489_v29 = vand.u32 2147483648, %v1226_v10  ;;  %905 = vrcp.f32 %v1245_v61 }
 0x19a   :  { %v347_v0 = vsub.f32 %v1113_v16, %v321_v34  ;;  %v481_v34 = vmul.f32 %v1249_v38, %v480_v52  ;;  %v376_v16 = vmul.f32 %v1261_v12, %v375_v44  ;;  %v371_v36 = vsel %vm368_vm8, %v370_v31, %v366_v7 }
 0x19b   :  { %616 = vrot.lane.b32.xlu0 %v343_v35, %s943_s0  ;;  %v431_v35 = vsel %vm428_vm9, %v430_v4, %v426_v6  ;;  %v540_v39 = vsub.f32 1.0, %v539_v17  ;;  %v372_v30 = vmul.f32 %v1106_v8, %v371_v36  ;;  %907 = vrcp.f32 %v1266_v3 }
 0x19c   :  { %624 = vrot.lane.b32.xlu2 %v347_v0, %s943_s0  ;;  %v902_v33 = vpop.eup %901  ;;  %v482_v52 = vadd.f32 %v1249_v38, %v481_v34  ;;  %v377_v44 = vadd.f32 %v1261_v12, %v376_v16  ;;  %v432_v49 = vmul.f32 %v1102_v5, %v431_v35  ;;  %v382_v5 = vand.u32 2147483647, %v1243_v2 }
 0x19d   :  { %v1311_v9 = vpop.xlane.xlu1 %281  ;;  %v329_v62 = vmul.f32 0.6931472, %v902_v33  ;;  %909 = vlog2.f32 %v1276_v57  ;;  %v490_v4 = vor.u32 1.1754944e-38, %v489_v29  ;;  %v385_v31 = vor.u32 1.1754944e-38, %v384_v50 }
 0x19e   :  { %v904_v54 = vpop.eup %903  ;;  %v1321_v0 = vpop.xlane.xlu0 %305  ;;  %v486_v10 = vsel %vm1328_vm13, %v1249_v38, %v482_v52  ;;  %v381_v2 = vsel %vm1335_vm15, %v1261_v12, %v377_v44  ;;  %vm383_vm2 = vcmp.eq.f32.partialorder %v382_v5, 8.507059e+37  ;;  %vm544_vm3 = vweird.f32 %v1274_v46 }
 0x19f   :  { %v351_v17 = vsub.f32 %v1136_v37, %v329_v62  ;;  %v541_v37 = vmul.f32 %v1274_v46, %v540_v39  ;;  %v337_v6 = vmul.f32 0.6931472, %v904_v54  ;;  %911 = vlog2.f32 %v1321_v0  ;;  %v1351_v34 = vpop.eup %905  ;;  %v1354_v38 = vpop.xlane.xlu2 %293  ;;  %vm545_vm5 = vmor %vm543_vm4, %vm544_vm3 }
 0x1a0   :  { %913 = vrcp.f32 %v1276_v57  ;;  %v491_v16 = vsel %vm488_vm0, %v490_v4, %v486_v10  ;;  %v386_v36 = vsel %vm383_vm2, %v385_v31, %v381_v2  ;;  %v549_v33 = vand.u32 2147483648, %v1228_v23 }
 0x1a1   :  { %632 = vrot.lane.b32.xlu1 %v351_v17, %s943_s0  ;;  %v542_v12 = vadd.f32 %v1274_v46, %v541_v37  ;;  %v1357_v35 = vpop.eup %907  ;;  %v355_v39 = vsub.f32 %v1121_v21, %v337_v6  ;;  %v434_v62 = vmul.f32 %v1351_v34, %v1245_v61  ;;  %915 = vrcp.f32 %v1354_v38 }
 0x1a2   :  { %v492_v44 = vmul.f32 %v1118_v18, %v491_v16  ;;  %917 = vlog2.f32 %v1354_v38  ;;  %v550_v18 = vor.u32 1.1754944e-38, %v549_v33  ;;  %vm439_vm8 = vweird.f32 %v1351_v34 }
 0x1a3   :  { %678 = vrot.lane.b32.xlu0 %v372_v30, %s944_s2  ;;  %v910_v29 = vpop.eup %909  ;;  %v387_v30 = vmul.f32 %v1145_v45, %v386_v36  ;;  %v546_v23 = vsel %vm545_vm5, %v1274_v46, %v542_v12  ;;  %919 = vlog2.f32 %v1311_v9  ;;  %v435_v50 = vsub.f32 1.0, %v434_v62  ;;  %vm1428_vm11 = vmor %vm438_vm7, %vm439_vm8 }
 0x1a4   :  { %686 = vrot.lane.b32.xlu2 %v432_v49, %s944_s2  ;;  %v494_v49 = vmul.f32 %v1357_v35, %v1266_v3  ;;  %v551_v54 = vsel %vm548_vm6, %v550_v18, %v546_v23  ;;  %v315_v17 = vmul.f32 0.6931472, %v910_v29  ;;  %v504_v29 = vand.u32 2147483648, %v1266_v3 }
 0x1a5   :  { %v1366_v52 = vpop.xlane.xlu1 %272  ;;  %v912_v21 = vpop.eup %911  ;;  %v552_v2 = vmul.f32 %v1125_v24, %v551_v54  ;;  %v436_v36 = vmul.f32 %v1351_v34, %v435_v50  ;;  %vm499_vm9 = vweird.f32 %v1357_v35  ;;  %v444_v23 = vand.u32 2147483648, %v1245_v61 }
 0x1a6   :  { %v1380_v45 = vpop.eup %913  ;;  %921 = vlog2.f32 %v1366_v52  ;;  %v339_v7 = vmul.f32 0.6931472, %v912_v21  ;;  %v495_v5 = vsub.f32 1.0, %v494_v49  ;;  %v1391_v4 = vpop.xlane.xlu0 %296  ;;  %v344_v31 = vsub.f32 %v1133_v32, %v315_v17  ;;  %vm1441_vm13 = vmor %vm498_vm10, %vm499_vm9 }
 0x1a7   :  { %923 = vrcp.f32 %v1311_v9  ;;  %v1384_v46 = vpop.eup %915  ;;  %v389_v8 = vmul.f32 %v1380_v45, %v1276_v57  ;;  %v442_v32 = vand.u32 2147483647, %v1245_v61  ;;  %v502_v50 = vand.u32 2147483647, %v1266_v3 }
 0x1a8   :  { %v918_v10 = vpop.eup %917  ;;  %v356_v16 = vsub.f32 %v1142_v41, %v339_v7  ;;  %v509_v33 = vmul.f32 %v1384_v46, %v1354_v38  ;;  %vm394_vm14 = vweird.f32 %v1380_v45  ;;  %vm393_vm0 = vweird.f32 %v1276_v57 }
 0x1a9   :  { %694 = vrot.lane.b32.xlu1 %v492_v44, %s944_s2  ;;  %v920_v6 = vpop.eup %919  ;;  %v390_v24 = vsub.f32 1.0, %v389_v8  ;;  %v331_v53 = vmul.f32 0.6931472, %v918_v10  ;;  %vm1432_vm12 = vcmp.eq.f32.partialorder %v442_v32, 8.507059e+37  ;;  %vm503_vm15 = vcmp.eq.f32.partialorder %v502_v50, 8.507059e+37  ;;  %vm1478_vm2 = vmor %vm393_vm0, %vm394_vm14 }
 0x1aa   :  { %v323_v62 = vmul.f32 0.6931472, %v920_v6  ;;  %v510_v21 = vsub.f32 1.0, %v509_v33  ;;  %v399_v33 = vand.u32 2147483648, %v1276_v57  ;;  %v397_v32 = vand.u32 2147483647, %v1276_v57 }
 0x1ab   :  { %640 = vrot.lane.b32.xlu0 %v355_v39, %s943_s0  ;;  %v496_v39 = vmul.f32 %v1357_v35, %v495_v5  ;;  %v391_v54 = vmul.f32 %v1380_v45, %v390_v24  ;;  %v352_v7 = vsub.f32 %v1153_v51, %v331_v53  ;;  %v505_v5 = vor.u32 1.1754944e-38, %v504_v29 }
 0x1ac   :  { %680 = vrot.lane.b32.xlu2 %v387_v30, %s944_s2  ;;  %v1388_v37 = vpop.xlane.xlu2 %284  ;;  %v922_v12 = vpop.eup %921  ;;  %v437_v30 = vadd.f32 %v1351_v34, %v436_v36  ;;  %v348_v3 = vsub.f32 %v1158_v58, %v323_v62  ;;  %v445_v58 = vor.u32 1.1754944e-38, %v444_v23  ;;  %vm514_vm3 = vweird.f32 %v1384_v46 }
 0x1ad   :  { %925 = vrcp.f32 %v1388_v37  ;;  %v1405_v41 = vpop.eup %923  ;;  %v317_v44 = vmul.f32 0.6931472, %v922_v12  ;;  %v497_v49 = vadd.f32 %v1357_v35, %v496_v39  ;;  %v1474_v62 = vpop.xlane.xlu1 %308  ;;  %v519_v57 = vand.u32 2147483648, %v1354_v38 }
 0x1ae   :  { %927 = vlog2.f32 %v1391_v4  ;;  %v449_v18 = vmul.f32 %v1405_v41, %v1311_v9  ;;  %v441_v61 = vsel %vm1428_vm11, %v1351_v34, %v437_v30  ;;  %v392_v34 = vadd.f32 %v1380_v45, %v391_v54 }
 0x1af   :  { %929 = vrcp.f32 %v1279_v26  ;;  %vm513_vm4 = vweird.f32 %v1354_v38  ;;  %vm398_vm5 = vcmp.eq.f32.partialorder %v397_v32, 8.507059e+37  ;;  %vm454_vm7 = vweird.f32 %v1405_v41 }
 0x1b0   :  { %931 = vrcp.f32 %v1366_v52  ;;  %v450_v36 = vsub.f32 1.0, %v449_v18  ;;  %v396_v18 = vsel %vm1478_vm2, %v1380_v45, %v392_v34  ;;  %vm1501_vm6 = vmor %vm513_vm4, %vm514_vm3  ;;  %vm453_vm9 = vweird.f32 %v1311_v9 }
 0x1b1   :  { %618 = vrot.lane.b32.xlu1 %v344_v31, %s943_s0  ;;  %933 = vrcp.f32 %v1391_v4  ;;  %v501_v31 = vsel %vm1441_vm13, %v1357_v35, %v497_v49  ;;  %v446_v35 = vsel %vm1432_vm12, %v445_v58, %v441_v61  ;;  %vm1526_vm10 = vmor %vm453_vm9, %vm454_vm7  ;;  %vm468_vm13 = vweird.f32 %v1388_v37 }
 0x1b2   :  { %935 = vlog2.f32 %v1388_v37  ;;  %v506_v39 = vsel %vm503_vm15, %v505_v5, %v501_v31  ;;  %v447_v23 = vmul.f32 %v1139_v40, %v446_v35  ;;  %v451_v50 = vmul.f32 %v1405_v41, %v450_v36 }
 0x1b3   :  { %702 = vrot.lane.b32.xlu0 %v552_v2, %s944_s2  ;;  %v1420_v17 = vpop.eup %925  ;;  %v345_v2 = vsub.f32 %v1177_v11, %v317_v44  ;;  %v511_v11 = vmul.f32 %v1384_v46, %v510_v21  ;;  %937 = vrcp.f32 %v1321_v0  ;;  %v507_v54 = vmul.f32 %v1167_v1, %v506_v39 }
 0x1b4   :  { %642 = vrot.lane.b32.xlu2 %v356_v16, %s943_s0  ;;  %v928_v6 = vpop.eup %927  ;;  %v464_v12 = vmul.f32 %v1420_v17, %v1388_v37  ;;  %v517_v5 = vand.u32 2147483647, %v1354_v38  ;;  %939 = vrcp.f32 %v1474_v62  ;;  %v459_v31 = vand.u32 2147483648, %v1311_v9 }
 0x1b5   :  { %v1454_v16 = vpop.eup %929  ;;  %v333_v24 = vmul.f32 0.6931472, %v928_v6  ;;  %v512_v30 = vadd.f32 %v1384_v46, %v511_v11  ;;  %941 = vlog2.f32 %v1474_v62  ;;  %v457_v11 = vand.u32 2147483647, %v1311_v9 }
 0x1b6   :  { %v1468_v53 = vpop.eup %931  ;;  %v1472_v29 = vmul.f32 %v1454_v16, %v1279_v26  ;;  %v465_v49 = vsub.f32 1.0, %v464_v12  ;;  %vm518_vm8 = vcmp.eq.f32.partialorder %v517_v5, 8.507059e+37  ;;  %vm469_vm11 = vweird.f32 %v1420_v17 }
 0x1b7   :  { %v1485_v21 = vpop.eup %933  ;;  %v404_v10 = vmul.f32 %v1468_v53, %v1366_v52  ;;  %v353_v40 = vsub.f32 %v1164_v63, %v333_v24  ;;  %v452_v63 = vadd.f32 %v1405_v41, %v451_v50  ;;  %v474_v44 = vand.u32 2147483648, %v1388_v37  ;;  %vm1546_vm14 = vmor %vm468_vm13, %vm469_vm11 }
 0x1b8   :  { %v936_v8 = vpop.eup %935  ;;  %v524_v1 = vmul.f32 %v1485_v21, %v1391_v4  ;;  %v466_v61 = vmul.f32 %v1420_v17, %v465_v49  ;;  %v555_v36 = vsub.f32 1.0, %v1472_v29  ;;  %vm458_vm12 = vcmp.eq.f32.partialorder %v457_v11, 8.507059e+37 }
 0x1b9   :  { %626 = vrot.lane.b32.xlu1 %v348_v3, %s943_s0  ;;  %v516_v3 = vsel %vm1501_vm6, %v1384_v46, %v512_v30  ;;  %v1511_v51 = vpop.eup %937  ;;  %v325_v6 = vmul.f32 0.6931472, %v936_v8  ;;  %v405_v46 = vsub.f32 1.0, %v404_v10  ;;  %v456_v24 = vsel %vm1526_vm10, %v1405_v41, %v452_v63 }
 0x1ba   :  { %v569_v12 = vmul.f32 %v1511_v51, %v1321_v0  ;;  %v525_v39 = vsub.f32 1.0, %v524_v1  ;;  %v467_v9 = vadd.f32 %v1420_v17, %v466_v61  ;;  %vm408_vm15 = vweird.f32 %v1366_v52 }
 0x1bb   :  { %634 = vrot.lane.b32.xlu0 %v352_v7, %s943_s0  ;;  %v400_v7 = vor.u32 1.1754944e-38, %v399_v33  ;;  %v1530_v33 = vpop.eup %939  ;;  %v349_v32 = vsub.f32 %v1197_v42, %v325_v6  ;;  %v406_v49 = vmul.f32 %v1468_v53, %v405_v46  ;;  %vm409_vm2 = vweird.f32 %v1468_v53 }
 0x1bc   :  { %620 = vrot.lane.b32.xlu2 %v345_v2, %s943_s0  ;;  %v520_v2 = vor.u32 1.1754944e-38, %v519_v57  ;;  %v942_v30 = vpop.eup %941  ;;  %v472_v57 = vand.u32 2147483647, %v1388_v37  ;;  %v584_v41 = vmul.f32 %v1530_v33, %v1474_v62  ;;  %v526_v37 = vmul.f32 %v1485_v21, %v525_v39 }
 0x1bd   :  { %v401_v38 = vsel %vm398_vm5, %v400_v7, %v396_v18  ;;  %v556_v18 = vmul.f32 %v1454_v16, %v555_v36  ;;  %v570_v50 = vsub.f32 1.0, %v569_v12  ;;  %v475_v7 = vor.u32 1.1754944e-38, %v474_v44  ;;  %vm1568_vm5 = vmor %vm408_vm15, %vm409_vm2 }
 0x1be   :  { %v521_v58 = vsel %vm518_vm8, %v520_v2, %v516_v3  ;;  %v402_v34 = vmul.f32 %v1160_v59, %v401_v38  ;;  %v460_v59 = vor.u32 1.1754944e-38, %v459_v31  ;;  %vm473_vm0 = vcmp.eq.f32.partialorder %v472_v57, 8.507059e+37 }
 0x1bf   :  { %v522_v29 = vmul.f32 %v1181_v22, %v521_v58  ;;  %v471_v22 = vsel %vm1546_vm14, %v1420_v17, %v467_v9  ;;  %v407_v8 = vadd.f32 %v1468_v53, %v406_v49  ;;  %v585_v10 = vsub.f32 1.0, %v584_v41 }
 0x1c0   :  { %v412_v17 = vand.u32 2147483647, %v1366_v52  ;;  %vm529_vm3 = vweird.f32 %v1485_v21  ;;  %v414_v45 = vand.u32 2147483648, %v1366_v52  ;;  %v527_v1 = vadd.f32 %v1485_v21, %v526_v37 }
 0x1c1   :  { %688 = vrot.lane.b32.xlu1 %v447_v23, %s944_s2  ;;  %v461_v23 = vsel %vm458_vm12, %v460_v59, %v456_v24  ;;  %v557_v38 = vadd.f32 %v1454_v16, %v556_v18  ;;  %vm559_vm4 = vweird.f32 %v1454_v16  ;;  %vm528_vm6 = vweird.f32 %v1391_v4 }
 0x1c2   :  { %v462_v5 = vmul.f32 %v1187_v28, %v461_v23  ;;  %v534_v2 = vand.u32 2147483648, %v1391_v4  ;;  %v564_v63 = vand.u32 2147483648, %v1279_v26  ;;  %vm1576_vm7 = vmor %vm528_vm6, %vm529_vm3  ;;  %v532_v6 = vand.u32 2147483647, %v1391_v4 }
 0x1c3   :  { %696 = vrot.lane.b32.xlu0 %v507_v54, %s944_s2  ;;  %v341_v54 = vmul.f32 0.6931472, %v942_v30  ;;  %vm558_vm8 = vweird.f32 %v1279_v26  ;;  %v411_v31 = vsel %vm1568_vm5, %v1468_v53, %v407_v8  ;;  %v415_v4 = vor.u32 1.1754944e-38, %v414_v45 }
 0x1c4   :  { %636 = vrot.lane.b32.xlu2 %v353_v40, %s943_s0  ;;  %v476_v40 = vsel %vm473_vm0, %v475_v7, %v471_v22  ;;  %vm1587_vm9 = vmor %vm558_vm8, %vm559_vm4  ;;  %v571_v53 = vmul.f32 %v1511_v51, %v570_v50  ;;  %vm413_vm10 = vcmp.eq.f32.partialorder %v412_v17, 8.507059e+37  ;;  %v535_v11 = vor.u32 1.1754944e-38, %v534_v2 }
 0x1c5   :  { %v357_v28 = vsub.f32 %v1185_v27, %v341_v54  ;;  %v477_v52 = vmul.f32 %v1210_v60, %v476_v40  ;;  %v562_v27 = vand.u32 2147483647, %v1279_v26  ;;  %v586_v60 = vmul.f32 %v1530_v33, %v585_v10 }
 0x1c6   :  { %v531_v26 = vsel %vm1576_vm7, %v1485_v21, %v527_v1  ;;  %v561_v58 = vsel %vm1587_vm9, %v1454_v16, %v557_v38  ;;  %v565_v36 = vor.u32 1.1754944e-38, %v564_v63  ;;  %v416_v12 = vsel %vm413_vm10, %v415_v4, %v411_v31 }
 0x1c7   :  { %vm533_vm11 = vcmp.eq.f32.partialorder %v532_v6, 8.507059e+37  ;;  %vm563_vm12 = vcmp.eq.f32.partialorder %v562_v27, 8.507059e+37  ;;  %v587_v39 = vadd.f32 %v1530_v33, %v586_v60  ;;  %vm589_vm13 = vweird.f32 %v1530_v33  ;;  %v1789_v60 = vld [vmem:[#allocation2_spill] sm:$0xff] }
 0x1c8   :  { %v566_v35 = vsel %vm563_vm12, %v565_v36, %v561_v58  ;;  %v594_v21 = vand.u32 2147483648, %v1474_v62  ;;  %v572_v24 = vadd.f32 %v1511_v51, %v571_v53  ;;  %vm574_vm14 = vweird.f32 %v1511_v51 }
 0x1c9   :  { %682 = vrot.lane.b32.xlu1 %v402_v34, %s944_s2  ;;  %v536_v34 = vsel %vm533_vm11, %v535_v11, %v531_v26  ;;  %v417_v16 = vmul.f32 %v1201_v48, %v416_v12  ;;  %vm588_vm15 = vweird.f32 %v1474_v62  ;;  %v592_v9 = vand.u32 2147483647, %v1474_v62  ;;  %v1790_v26 = vld [vmem:[#allocation3_spill] sm:$0xff] }
 0x1ca   :  { %v567_v59 = vmul.f32 %v1155_v56, %v566_v35  ;;  %vm590_vm0 = vmor %vm588_vm15, %vm589_vm13  ;;  %vm573_vm2 = vweird.f32 %v1321_v0  ;;  %v577_v44 = vand.u32 2147483647, %v1321_v0  ;;  %v595_v48 = vor.u32 1.1754944e-38, %v594_v21  ;;  %v1791_v35 = vld [vmem:[#allocation4_spill] sm:$0xff] }
 0x1cb   :  { %628 = vrot.lane.b32.xlu0 %v349_v32, %s943_s0  ;;  %v579_v32 = vand.u32 2147483648, %v1321_v0  ;;  %v591_v30 = vsel %vm590_vm0, %v1530_v33, %v587_v39  ;;  %vm575_vm3 = vmor %vm573_vm2, %vm574_vm14  ;;  %vm593_vm4 = vcmp.eq.f32.partialorder %v592_v9, 8.507059e+37  ;;  %vm742_vm6 = vcmask 130048  }
 0x1cc   :  { %698 = vrot.lane.b32.xlu2 %v522_v29, %s944_s2  ;;  %v537_v29 = vmul.f32 %v1199_v47, %v536_v34  ;;  %v576_v62 = vsel %vm575_vm3, %v1511_v51, %v572_v24  ;;  %v596_v56 = vsel %vm593_vm4, %v595_v48, %v591_v30  ;;  %vm578_vm5 = vcmp.eq.f32.partialorder %v577_v44, 8.507059e+37  ;;  %v1792_v24 = vld [vmem:[#allocation11_spill] sm:$0xff] }
 0x1cd   :  { %v580_v47 = vor.u32 1.1754944e-38, %v579_v32  ;;  %v597_v49 = vmul.f32 %v1208_v55, %v596_v56  ;;  %vm759_vm7 = vcmask 195584  }
 0x1cf   :  { %v581_v57 = vsel %vm578_vm5, %v580_v47, %v576_v62  ;;  %v1794_v62 = vld [vmem:[#allocation9_spill] sm:$0xff] }
 0x1d0   :  { %v582_v0 = vmul.f32 %v1179_v15, %v581_v57  ;;  %v1795_v57 = vld [vmem:[#allocation8_spill] sm:$0xff] }
 0x1d1   :  { %644 = vrot.lane.b32.xlu1 %v357_v28, %s943_s0 }
 0x1d3   :  { %690 = vrot.lane.b32.xlu0 %v462_v5, %s944_s2 }
 0x1d4   :  { %692 = vrot.lane.b32.xlu2 %v477_v52, %s944_s2 }
 0x1d9   :  { %700 = vrot.lane.b32.xlu1 %v537_v29, %s944_s2  ;;  %v1793_v29 = vld [vmem:[#allocation7_spill] sm:$0xff] }
 0x1db   :  { %684 = vrot.lane.b32.xlu0 %v417_v16, %s944_s2 }
 0x1dc   :  { %704 = vrot.lane.b32.xlu2 %v567_v59, %s944_s2 }
 0x1e1   :  { %706 = vrot.lane.b32.xlu1 %v582_v0, %s944_s2 }
 0x1e3   :  { %708 = vrot.lane.b32.xlu0 %v597_v49, %s944_s2 }
 0x1e5   :  { %v615_v33 = vpop.permute.xlu2 %614 }
 0x1ed   :  { %v631_v41 = vpop.permute.xlu2 %630 }
 0x1ee   :  { %v734_v17 = vsel %vm165_vm1, %v1022_v20, %v631_v41 }
 0x1f6   :  { %v625_v23 = vpop.permute.xlu2 %624 }
 0x1f7   :  { %v731_v4 = vsel %vm165_vm1, %v1789_v60, %v625_v23  ;;  %v1796_v23 = vld [vmem:[#allocation10_spill] sm:$0xff] }
 0x1fc   :  { %v623_v42 = vpop.permute.xlu0 %622 }
 0x1fd   :  { %v730_v22 = vsel %vm165_vm1, %v1012_v14, %v623_v42  ;;  %v726_v14 = vsel %vm165_vm1, %v1009_v13, %v615_v33 }
 0x1fe   :  { %v687_v51 = vpop.permute.xlu2 %686 }
 0x1ff   :  { %v747_v37 = vsel %vm742_vm6, %v730_v22, %v687_v51  ;;  %v1797_v22 = vld [vmem:[#allocation6_spill] sm:$0xff] }
 0x200   :  { %764 = vst.msk [vmem:[%s1741_s3 + $0x20] sm:$0xff] %vm759_vm7, %v747_v37 }
 0x204   :  { %v639_v18 = vpop.permute.xlu1 %638 }
 0x205   :  { %v738_v13 = vsel %vm165_vm1, %v1019_v19, %v639_v18  ;;  %v1788_v19 = vld [vmem:[#allocation5_spill] sm:$0xff] }
 0x206   :  { %v681_v15 = vpop.permute.xlu2 %680 }
 0x20d   :  { %v617_v55 = vpop.permute.xlu0 %616 }
 0x20e   :  { %v1630_v50 = vpop.permute.xlu2 %642  ;;  %v727_v54 = vsel %vm165_vm1, %v1029_v25, %v617_v55 }
 0x20f   :  { %v744_v7 = vsel %vm742_vm6, %v727_v54, %v681_v15  ;;  %v740_v37 = vsel %vm165_vm1, %v1797_v22, %v1630_v50 }
 0x210   :  { %761 = vst.msk [vmem:[%s1741_s3 + $0x8] sm:$0xff] %vm759_vm7, %v744_v7 }
 0x213   :  { %v633_v8 = vpop.permute.xlu1 %632 }
 0x214   :  { %v735_v31 = vsel %vm165_vm1, %v1788_v19, %v633_v8 }
 0x215   :  { %v679_v5 = vpop.permute.xlu0 %678 }
 0x216   :  { %v621_v10 = vpop.permute.xlu2 %620  ;;  %v743_v40 = vsel %vm742_vm6, %v726_v14, %v679_v5 }
 0x217   :  { %760 = vst.msk [vmem:[%s1741_s3] sm:$0xff] %vm759_vm7, %v743_v40  ;;  %v729_v47 = vsel %vm165_vm1, %v1794_v62, %v621_v10 }
 0x21b   :  { %v695_v45 = vpop.permute.xlu1 %694 }
 0x21c   :  { %v751_v38 = vsel %vm742_vm6, %v734_v17, %v695_v45 }
 0x21d   :  { %v641_v25 = vpop.permute.xlu0 %640  ;;  %768 = vst.msk [vmem:[%s1741_s3 + $0x40] sm:$0xff] %vm759_vm7, %v751_v38 }
 0x21e   :  { %v637_v1 = vpop.permute.xlu2 %636  ;;  %v739_v58 = vsel %vm165_vm1, %v1790_v26, %v641_v25 }
 0x21f   :  { %v737_v49 = vsel %vm165_vm1, %v1795_v57, %v637_v1 }
 0x223   :  { %v619_v3 = vpop.permute.xlu1 %618 }
 0x224   :  { %v728_v39 = vsel %vm165_vm1, %v1791_v35, %v619_v3 }
 0x225   :  { %v703_v28 = vpop.permute.xlu0 %702 }
 0x226   :  { %v699_v2 = vpop.permute.xlu2 %698  ;;  %v755_v63 = vsel %vm742_vm6, %v738_v13, %v703_v28 }
 0x227   :  { %772 = vst.msk [vmem:[%s1741_s3 + $0x60] sm:$0xff] %vm759_vm7, %v755_v63 }
 0x22b   :  { %v627_v52 = vpop.permute.xlu1 %626 }
 0x22c   :  { %v732_v59 = vsel %vm165_vm1, %v1793_v29, %v627_v52 }
 0x22d   :  { %v635_v20 = vpop.permute.xlu0 %634 }
 0x22e   :  { %v693_v61 = vpop.permute.xlu2 %692  ;;  %v736_v6 = vsel %vm165_vm1, %v1059_v43, %v635_v20 }
 0x22f   :  { %v753_v27 = vsel %vm742_vm6, %v736_v6, %v699_v2 }
 0x230   :  { %770 = vst.msk [vmem:[%s1741_s3 + $0x50] sm:$0xff] %vm759_vm7, %v753_v27 }
 0x233   :  { %v689_v53 = vpop.permute.xlu1 %688 }
 0x234   :  { %v748_v36 = vsel %vm742_vm6, %v731_v4, %v689_v53 }
 0x235   :  { %v697_v46 = vpop.permute.xlu0 %696  ;;  %765 = vst.msk [vmem:[%s1741_s3 + $0x28] sm:$0xff] %vm759_vm7, %v748_v36 }
 0x236   :  { %v705_v11 = vpop.permute.xlu2 %704  ;;  %v752_v43 = vsel %vm742_vm6, %v735_v31, %v697_v46 }
 0x237   :  { %v756_v12 = vsel %vm742_vm6, %v739_v58, %v705_v11  ;;  %769 = vst.msk [vmem:[%s1741_s3 + $0x48] sm:$0xff] %vm759_vm7, %v752_v43 }
 0x238   :  { %773 = vst.msk [vmem:[%s1741_s3 + $0x68] sm:$0xff] %vm759_vm7, %v756_v12 }
 0x23b   :  { %v683_v21 = vpop.permute.xlu1 %682 }
 0x23c   :  { %v745_v9 = vsel %vm742_vm6, %v728_v39, %v683_v21 }
 0x23d   :  { %v629_v34 = vpop.permute.xlu0 %628  ;;  %762 = vst.msk [vmem:[%s1741_s3 + $0x10] sm:$0xff] %vm759_vm7, %v745_v9 }
 0x23e   :  { %v733_v16 = vsel %vm165_vm1, %v1792_v24, %v629_v34 }
 0x23f   :  { %v750_v32 = vsel %vm742_vm6, %v733_v16, %v693_v61 }
 0x240   :  { %767 = vst.msk [vmem:[%s1741_s3 + $0x38] sm:$0xff] %vm759_vm7, %v750_v32 }
 0x243   :  { %v645_v30 = vpop.permute.xlu1 %644 }
 0x244   :  { %v741_v42 = vsel %vm165_vm1, %v1796_v23, %v645_v30 }
 0x245   :  { %v691_v44 = vpop.permute.xlu0 %690 }
 0x246   :  { %v749_v48 = vsel %vm742_vm6, %v732_v59, %v691_v44 }
 0x247   :  { %766 = vst.msk [vmem:[%s1741_s3 + $0x30] sm:$0xff] %vm759_vm7, %v749_v48 }
 0x24b   :  { %v701_v0 = vpop.permute.xlu1 %700 }
 0x24c   :  { %v754_v41 = vsel %vm742_vm6, %v737_v49, %v701_v0 }
 0x24d   :  { %v685_v56 = vpop.permute.xlu0 %684  ;;  %771 = vst.msk [vmem:[%s1741_s3 + $0x58] sm:$0xff] %vm759_vm7, %v754_v41 }
 0x24e   :  { %v746_v33 = vsel %vm742_vm6, %v729_v47, %v685_v56 }
 0x24f   :  { %763 = vst.msk [vmem:[%s1741_s3 + $0x18] sm:$0xff] %vm759_vm7, %v746_v33 }
 0x253   :  { %v707_v15 = vpop.permute.xlu1 %706 }
 0x254   :  { %v757_v18 = vsel %vm742_vm6, %v740_v37, %v707_v15 }
 0x255   :  { %v709_v51 = vpop.permute.xlu0 %708  ;;  %774 = vst.msk [vmem:[%s1741_s3 + $0x70] sm:$0xff] %vm759_vm7, %v757_v18 }
 0x256   :  { %v758_v55 = vsel %vm742_vm6, %v741_v42, %v709_v51 }
 0x257   :  { %775 = vst.msk [vmem:[%s1741_s3 + $0x78] sm:$0xff] %vm759_vm7, %v758_v55 }

</bundles_post_ra>
